<compile_context>
chip_gen: v5e
topology: v5e:2x2
jax: 0.10.0
libtpu: 0.0.40
codegen_flags: <defaults>
</compile_context>

<pallas_src>
import jax
import jax.numpy as jnp
from jax.experimental import pallas as pl
from jax.experimental.pallas import tpu as pltpu


def _round_up(x: int, m: int) -> int:
    return (x + m - 1) // m * m


def _vmem_budget_bytes() -> int:
    """~75% of per-core VMEM: ~48 MiB on v7x, ~96 MiB on v5e/v6e."""
    cap = 64 * 1024 * 1024  # conservative default (v7x per-TC VMEM)
    try:
        info = pltpu.get_tpu_info()
        cap = int(getattr(info, "vmem_capacity_bytes", cap)) or cap
    except Exception:
        pass
    return int(cap * 0.75)


# --------------------------- kernels ---------------------------


def _ffn_kernel_resident(x_ref, w1_ref, b1_ref, w2_ref, b2_ref, o_ref):
    # Weights fully VMEM-resident (constant index_map); one pass per row tile,
    # no accumulator scratch, no init/finalize phases.
    h = jnp.dot(x_ref[...], w1_ref[...], preferred_element_type=jnp.float32)
    h = jnp.maximum(h + b1_ref[...], 0.0)
    y = jnp.dot(h.astype(w2_ref.dtype), w2_ref[...],
                preferred_element_type=jnp.float32)
    # Dropout in eval mode is identity.
    # TODO(synk): training-mode dropout would use pltpu.prng_seed + prng_random_bits.
    o_ref[...] = (y + b2_ref[...]).astype(o_ref.dtype)


def _ffn_kernel_tiled(x_ref, w1_ref, b1_ref, w2_ref, b2_ref, o_ref, acc_ref):
    # Fallback for very large H: hidden axis tiled, f32 accumulator (P3).
    j = pl.program_id(1)

    @pl.when(j == 0)
    def _():
        acc_ref[...] = jnp.zeros_like(acc_ref)

    h = jnp.dot(x_ref[...], w1_ref[...], preferred_element_type=jnp.float32)
    h = jnp.maximum(h + b1_ref[...], 0.0)
    acc_ref[...] += jnp.dot(h.astype(w2_ref.dtype), w2_ref[...],
                            preferred_element_type=jnp.float32)

    @pl.when(j == pl.num_programs(1) - 1)
    def _():
        o_ref[...] = (acc_ref[...] + b2_ref[...]).astype(o_ref.dtype)


# --------------------------- host wrappers ---------------------------


def prepare_params(w1, b1, w2, b2, *, compute_dtype=jnp.bfloat16):
    """Pad weights to lane-friendly (x128) shapes and cast ONCE, outside the
    per-call hot path.  Zero-padding of H is safe because b1 is also
    zero-padded: ReLU(0 + 0) = 0 contributes nothing through zero w2 rows."""
    E, H = w1.shape
    E_pad, H_pad = _round_up(E, 128), _round_up(H, 128)
    w1p = jnp.pad(w1, ((0, E_pad - E), (0, H_pad - H))).astype(compute_dtype)
    b1p = jnp.pad(jnp.reshape(b1, (1, H)),
                  ((0, 0), (0, H_pad - H))).astype(jnp.float32)
    w2p = jnp.pad(w2, ((0, H_pad - H), (0, E_pad - E))).astype(compute_dtype)
    b2p = jnp.pad(jnp.reshape(b2, (1, E)),
                  ((0, 0), (0, E_pad - E))).astype(jnp.float32)
    return dict(w1=w1p, b1=b1p, w2=w2p, b2=b2p, E=E, H=H,
                E_pad=E_pad, H_pad=H_pad, compute_dtype=compute_dtype)


def feedforward_net(x, params, *, row_tile=512, hidden_tile=512):
    """x: (B, T, E).  params: output of prepare_params().  Returns (B, T, E)."""
    B, T, E = x.shape
    assert E == params["E"], "embed_size mismatch with prepared params"
    E_pad, H_pad = params["E_pad"], params["H_pad"]
    compute_dtype = params["compute_dtype"]
    w1c, b1f, w2c, b2f = params["w1"], params["b1"], params["w2"], params["b2"]

    N = B * T
    out_dtype = x.dtype
    cbytes = jnp.dtype(compute_dtype).itemsize
    obytes = jnp.dtype(out_dtype).itemsize

    # Row tile: as large as practical, but keep >= 2 row-grid steps when N
    # allows so v7x's two TensorCores both get work (no effect on v5e/v6e).
    TN = min(row_tile, _round_up(N, 8))
    if N > 8 and _round_up(N, TN) // TN < 2:
        TN = max(_round_up(-(-N // 2), 8), 8)
    N_pad = _round_up(N, TN)

    x2d = jnp.pad(x.reshape(N, E),
                  ((0, N_pad - N), (0, E_pad - E))).astype(compute_dtype)

    budget = _vmem_budget_bytes()
    flops = 2 * N_pad * (E_pad * H_pad + H_pad * E_pad)

    # ---------- resident-weights path (preferred) ----------
    resident_vmem = (
        2 * TN * E_pad * cbytes + 2 * TN * E_pad * obytes      # x/out, double-buffered
        + 2 * (E_pad * H_pad + H_pad * E_pad) * cbytes         # weights (buffer pair)
        + 2 * (H_pad + E_pad) * 4                              # biases
        + TN * H_pad * 4 + TN * E_pad * 4                      # f32 intermediates
    )

    if resident_vmem <= budget:
        cost = pl.CostEstimate(
            flops=flops,
            transcendentals=0,
            bytes_accessed=(x2d.size * cbytes
                            + (w1c.size + w2c.size) * cbytes        # weights read once
                            + (b1f.size + b2f.size) * 4
                            + N_pad * E_pad * obytes),
        )
        out2d = pl.pallas_call(
            _ffn_kernel_resident,
            out_shape=jax.ShapeDtypeStruct((N_pad, E_pad), out_dtype),
            grid_spec=pltpu.PrefetchScalarGridSpec(
                num_scalar_prefetch=0,
                grid=(N_pad // TN,),
                in_specs=[
                    pl.BlockSpec((TN, E_pad), lambda i: (i, 0)),        # x rows
                    pl.BlockSpec((E_pad, H_pad), lambda i: (0, 0)),     # w1 (resident)
                    pl.BlockSpec((1, H_pad), lambda i: (0, 0)),         # b1 (resident)
                    pl.BlockSpec((H_pad, E_pad), lambda i: (0, 0)),     # w2 (resident)
                    pl.BlockSpec((1, E_pad), lambda i: (0, 0)),         # b2 (resident)
                ],
                out_specs=pl.BlockSpec((TN, E_pad), lambda i: (i, 0)),
            ),
            compiler_params=pltpu.CompilerParams(
                dimension_semantics=("parallel",),
                vmem_limit_bytes=int(min(budget,
                                         max(int(resident_vmem * 1.25),
                                             16 * 1024 * 1024))),
            ),
            cost_estimate=cost,
        )(x2d, w1c, b1f, w2c, b2f)
        return out2d[:N, :E].reshape(B, T, E)

    # ---------- hidden-tiled fallback (very large H only) ----------
    TH = min(_round_up(hidden_tile, 128), H_pad)
    while H_pad % TH != 0:      # pick a 128-multiple that divides H_pad
        TH -= 128

    tiled_vmem = (
        2 * TN * E_pad * cbytes + 2 * TN * E_pad * obytes      # x/out, double-buffered
        + 2 * (E_pad * TH + TH * E_pad) * cbytes               # w1/w2 tiles, double-buffered
        + 2 * (TH + E_pad) * 4                                 # biases
        + TN * E_pad * 4                                       # f32 accumulator scratch
        + TN * TH * 4                                          # hidden intermediate
    )
    cost = pl.CostEstimate(
        flops=flops,
        transcendentals=0,
        bytes_accessed=(x2d.size * cbytes
                        + (N_pad // TN) * (w1c.size + w2c.size) * cbytes  # re-streamed
                        + (b1f.size + b2f.size) * 4
                        + N_pad * E_pad * obytes),
    )
    out2d = pl.pallas_call(
        _ffn_kernel_tiled,
        out_shape=jax.ShapeDtypeStruct((N_pad, E_pad), out_dtype),
        grid_spec=pltpu.PrefetchScalarGridSpec(
            num_scalar_prefetch=0,
            grid=(N_pad // TN, H_pad // TH),
            in_specs=[
                pl.BlockSpec((TN, E_pad), lambda i, j: (i, 0)),   # x rows
                pl.BlockSpec((E_pad, TH), lambda i, j: (0, j)),   # w1 hidden tile
                pl.BlockSpec((1, TH), lambda i, j: (0, j)),       # b1 hidden tile
                pl.BlockSpec((TH, E_pad), lambda i, j: (j, 0)),   # w2 hidden tile
                pl.BlockSpec((1, E_pad), lambda i, j: (0, 0)),    # b2 (resident)
            ],
            out_specs=pl.BlockSpec((TN, E_pad), lambda i, j: (i, 0)),
            scratch_shapes=[pltpu.VMEM((TN, E_pad), jnp.float32)],
        ),
        compiler_params=pltpu.CompilerParams(
            dimension_semantics=("parallel", "arbitrary"),
            vmem_limit_bytes=int(min(budget,
                                     max(int(tiled_vmem * 1.25),
                                         16 * 1024 * 1024))),
        ),
        cost_estimate=cost,
    )(x2d, w1c, b1f, w2c, b2f)
    return out2d[:N, :E].reshape(B, T, E)


def init_params(key, embed_size, hidden_size, dtype=jnp.float32):
    """Deterministic init mimicking nn.Linear's uniform(-1/sqrt(fan_in), +1/sqrt(fan_in))."""
    k1, k2, k3, k4 = jax.random.split(key, 4)
    bound1 = 1.0 / (embed_size ** 0.5)
    bound2 = 1.0 / (hidden_size ** 0.5)
    # Weights stored (in_features, out_features) for the kernel (transposed vs PyTorch).
    w1 = jax.random.uniform(k1, (embed_size, hidden_size), dtype, -bound1, bound1)
    b1 = jax.random.uniform(k2, (1, hidden_size), dtype, -bound1, bound1)
    w2 = jax.random.uniform(k3, (hidden_size, embed_size), dtype, -bound2, bound2)
    b2 = jax.random.uniform(k4, (1, embed_size), dtype, -bound2, bound2)
    return w1, b1, w2, b2


if __name__ == "__main__":
    key = jax.random.PRNGKey(0)
    kx, kp = jax.random.split(key)

    # Small, lane-dense demo shapes (embed/hidden multiples of 128).
    B, T, E, H = 2, 8, 128, 256
    dropout_p = 0.1  # unused at inference (identity)

    x = jax.random.normal(kx, (B, T, E), dtype=jnp.float32)
    w1, b1, w2, b2 = init_params(kp, E, H)

    # Reference in plain JAX.
    ref = (jnp.maximum(x.reshape(-1, E) @ w1 + b1, 0.0) @ w2 + b2).reshape(B, T, E)

    # Exact-precision path (f32 matmuls) for correctness check.
    params_f32 = prepare_params(w1, b1, w2, b2, compute_dtype=jnp.float32)
    y32 = feedforward_net(x, params_f32)
    jax.block_until_ready(y32)
    assert jnp.allclose(y32, ref, atol=1e-5, rtol=1e-5), "f32 mismatch vs reference"

    # Performance path: weights pre-padded/cast to bf16 ONCE, outside the hot path.
    params_bf16 = prepare_params(w1, b1, w2, b2, compute_dtype=jnp.bfloat16)
    ybf = feedforward_net(x, params_bf16)
    jax.block_until_ready(ybf)
    assert jnp.allclose(ybf, ref, atol=2e-2, rtol=2e-2), "bf16 mismatch vs reference"

    print("KERNEL_OK")
</pallas_src>

<mosaic_0001>
module attributes {stable_mosaic.version = 11 : i64} {
  func.func @_ffn_kernel_resident(%arg0: i32, %arg1: memref<8x128xf32, #tpu.memory_space<vmem>>, %arg2: memref<128x256xf32, #tpu.memory_space<vmem>>, %arg3: memref<1x256xf32, #tpu.memory_space<vmem>>, %arg4: memref<256x128xf32, #tpu.memory_space<vmem>>, %arg5: memref<1x128xf32, #tpu.memory_space<vmem>>, %arg6: memref<8x128xf32, #tpu.memory_space<vmem>>) attributes {dimension_semantics = [#tpu.dimension_semantics<parallel>], iteration_bounds = array<i64: 2>, scalar_prefetch = 0 : i64, scratch_operands = 0 : i64, tpu.core_type = #tpu.core_type<tc>, window_params = [{transform_indices = @transform_0, window_bounds = array<i64: 8, 128>}, {pipeline_mode = #tpu.pipeline_mode<synchronous>, transform_indices = @transform_1, window_bounds = array<i64: 128, 256>}, {pipeline_mode = #tpu.pipeline_mode<synchronous>, transform_indices = @transform_2, window_bounds = array<i64: 1, 256>}, {pipeline_mode = #tpu.pipeline_mode<synchronous>, transform_indices = @transform_3, window_bounds = array<i64: 256, 128>}, {pipeline_mode = #tpu.pipeline_mode<synchronous>, transform_indices = @transform_4, window_bounds = array<i64: 1, 128>}, {transform_indices = @transform_5, window_bounds = array<i64: 8, 128>}]} {
    %c0 = arith.constant 0 : index
    %c0_0 = arith.constant 0 : index
    %0 = vector.load %arg1[%c0, %c0_0] : memref<8x128xf32, #tpu.memory_space<vmem>>, vector<8x128xf32>
    %c0_1 = arith.constant 0 : index
    %c0_2 = arith.constant 0 : index
    %1 = vector.load %arg2[%c0_1, %c0_2] : memref<128x256xf32, #tpu.memory_space<vmem>>, vector<128x256xf32>
    %cst = arith.constant dense<0.000000e+00> : vector<8x256xf32>
    %2 = tpu.matmul %0, %1, %cst {dimension_numbers = #tpu.dot_dimension_numbers<[1], [0], [0], [1], [0, 0, 1, 1], [], []>} : vector<8x128xf32>, vector<128x256xf32>, vector<8x256xf32> -> vector<8x256xf32>
    %c0_3 = arith.constant 0 : index
    %c0_4 = arith.constant 0 : index
    %3 = vector.load %arg3[%c0_3, %c0_4] : memref<1x256xf32, #tpu.memory_space<vmem>>, vector<1x256xf32>
    %4 = vector.broadcast %3 : vector<1x256xf32> to vector<8x256xf32>
    %5 = arith.addf %2, %4 : vector<8x256xf32>
    %cst_5 = arith.constant 0.000000e+00 : f32
    %6 = vector.broadcast %cst_5 : f32 to vector<8x256xf32>
    %7 = arith.maximumf %5, %6 : vector<8x256xf32>
    %c0_6 = arith.constant 0 : index
    %c0_7 = arith.constant 0 : index
    %8 = vector.load %arg4[%c0_6, %c0_7] : memref<256x128xf32, #tpu.memory_space<vmem>>, vector<256x128xf32>
    %cst_8 = arith.constant dense<0.000000e+00> : vector<8x128xf32>
    %9 = tpu.matmul %7, %8, %cst_8 {dimension_numbers = #tpu.dot_dimension_numbers<[1], [0], [0], [1], [0, 0, 1, 1], [], []>} : vector<8x256xf32>, vector<256x128xf32>, vector<8x128xf32> -> vector<8x128xf32>
    %c0_9 = arith.constant 0 : index
    %c0_10 = arith.constant 0 : index
    %10 = vector.load %arg5[%c0_9, %c0_10] : memref<1x128xf32, #tpu.memory_space<vmem>>, vector<1x128xf32>
    %11 = vector.broadcast %10 : vector<1x128xf32> to vector<8x128xf32>
    %12 = arith.addf %9, %11 : vector<8x128xf32>
    %c0_11 = arith.constant 0 : index
    %c0_12 = arith.constant 0 : index
    %13 = vector.load %arg6[%c0_11, %c0_12] : memref<8x128xf32, #tpu.memory_space<vmem>>, vector<8x128xf32>
    tpu.vector_store %arg6[%c0_11, %c0_12], %12 {strides = array<i32>} : memref<8x128xf32, #tpu.memory_space<vmem>>, vector<8x128xf32>,
    return
  }
  func.func @transform_0(%arg0: i32) -> (i32, i32) {
    %c0_i32 = arith.constant 0 : i32
    %c0_i32_0 = arith.constant 0 : i32
    return %arg0, %c0_i32 : i32, i32
  }
  func.func @transform_1(%arg0: i32) -> (i32, i32) {
    %c0_i32 = arith.constant 0 : i32
    %c0_i32_0 = arith.constant 0 : i32
    %c0_i32_1 = arith.constant 0 : i32
    return %c0_i32, %c0_i32_0 : i32, i32
  }
  func.func @transform_2(%arg0: i32) -> (i32, i32) {
    %c0_i32 = arith.constant 0 : i32
    %c0_i32_0 = arith.constant 0 : i32
    %c0_i32_1 = arith.constant 0 : i32
    return %c0_i32, %c0_i32_0 : i32, i32
  }
  func.func @transform_3(%arg0: i32) -> (i32, i32) {
    %c0_i32 = arith.constant 0 : i32
    %c0_i32_0 = arith.constant 0 : i32
    %c0_i32_1 = arith.constant 0 : i32
    return %c0_i32, %c0_i32_0 : i32, i32
  }
  func.func @transform_4(%arg0: i32) -> (i32, i32) {
    %c0_i32 = arith.constant 0 : i32
    %c0_i32_0 = arith.constant 0 : i32
    %c0_i32_1 = arith.constant 0 : i32
    return %c0_i32, %c0_i32_0 : i32, i32
  }
  func.func @transform_5(%arg0: i32) -> (i32, i32) {
    %c0_i32 = arith.constant 0 : i32
    %c0_i32_0 = arith.constant 0 : i32
    return %arg0, %c0_i32 : i32, i32
  }
}

</mosaic_0001>

<bundles_post_ra>
// kernel: tpu_custom_call.1
= control target key start
LH: loop header
LB: loop body
LE: loop exit
PB: predicated region body
PF: predicated region fallthrough
CT: control target
= control target key end

     0   :  { %10 = vsyncpa [#allocation3], 0  ;;  %s1062_s0 = inlined_call_operand.hbm [shape: f32[16,128], index: 0, kind: input, shape index: {}]   ;;  %s1063_s1 = inlined_call_operand.hbm [shape: f32[128,256], index: 1, kind: input, shape index: {}]   ;;  %s1064_s2 = inlined_call_operand.hbm [shape: f32[1,256], index: 2, kind: input, shape index: {}]   ;;  %s1065_s3 = inlined_call_operand.hbm [shape: f32[256,128], index: 3, kind: input, shape index: {}]   ;;  %s1066_s4 = inlined_call_operand.vmem [shape: f32[1,128], index: 4, kind: input, shape index: {}]   ;;  %s1067_s5 = inlined_call_operand.hbm [shape: f32[16,128], index: 5, kind: output, shape index: {}]  }
   0x1   :  { %12 = vsyncpa [#allocation3 + $0x1], 0 }
   0x2   :  { %13 = vsyncpa [#allocation6], 0 }
   0x3   :  { %14 = vsyncpa [#allocation9], 0 }
   0x4   :  { %15 = vsyncpa [#allocation4], 0 }
   0x5   :  { %17 = vsyncpa [#allocation4 + $0x1], 0  ;;  %s896_s18 = smov 0   ;;  %s898_s19 = smov 0  }
   0x6   :  { %s900_s20 = smov 0   ;;  %s902_s21 = smov 0  }
   0x7 LB: > { %s175_s24 = sshll.u32 %s1063_s1, 4  ;;  %s920_s25 = sadd.s32 4294967295, %s857_s21   ;;  %s857_s21 = sphi %s902_s21, %s1078_s21   ;;  %s853_s20 = sphi %s900_s20, %s1077_s20   ;;  %s849_s19 = sphi %s898_s19, %s1076_s19   ;;  %s845_s18 = sphi %s896_s18, %s1075_s18   ;;  %s176_s24 = int_to_ptr.hbm [resolvable:$true] %s175_s24 }
   0x8   : > { %p564_p0 = scmp.ge.s32.totalorder %s857_s21, 1  ;;  %p44_p1 = scmp.eq.s32.totalorder %s920_s25, 0 }
   0x9   : > { %p164_p2 = scmp.lt.s32.totalorder %s857_s21, 3  ;;  %s859_s27 = smov [#allocation5]  }
   0xa   : > { %s177_s28 = sshll.u32 %s859_s27, 4  ;;  %s190_s6 = sshll.u32 %s1064_s2, 4  ;;  %s178_s28 = int_to_ptr.vmem [resolvable:$true] %s177_s28  ;;  %s191_s6 = int_to_ptr.hbm [resolvable:$true] %s190_s6 }
   0xb   : > { %p925_p3 = pnand %p564_p0, %p164_p2  ;;  %s201_s10 = sshll.u32 %s1065_s3, 4  ;;  %s202_s10 = int_to_ptr.hbm [resolvable:$true] %s201_s10 }
   0xc   : > { %s860_s11 = smov [#allocation7]   ;;  %s861_s13 = smov 256  }
   0xd   : > { %p597_p4 = pneg %p925_p3  ;;  %s192_s12 = sshll.u32 %s860_s11, 4  ;;  %s193_s12 = int_to_ptr.vmem [resolvable:$true] %s192_s12 }
   0xe   : > { %s862_s14 = smov 16   ;;  %s863_s15 = smov [#allocation8]  }
   0xf   : > { %p937_p6 = pnand %p597_p4, %p44_p1  ;;  %s203_s16 = sshll.u32 %s863_s15, 4  ;;  %s204_s16 = int_to_ptr.vmem [resolvable:$true] %s203_s16 }
  0x10   : > { %s864_s17 = smov 128   ;;  %s865_s22 = smov 8  }
  0x11   : > { %600 = dma.hbm_to_vmem [thread:$0]  (!%p937_p6), %s176_s24, 4096, %s178_s28, [#allocation6], %s861_s13, %s861_s13, %s862_s14  }
  0x12   : > { %603 = dma.hbm_to_vmem [thread:$0]  (!%p937_p6), %s191_s6, 32, %s193_s12, [#allocation6]  }
  0x13   : > { %606 = dma.hbm_to_vmem [thread:$0]  (!%p937_p6), %s202_s10, 4096, %s204_s16, [#allocation9], %s864_s17, %s864_s17, %s865_s22  }
  0x14   : > { %s563_s23 = sadd.s32 4294967294, %s857_s21   ;;  %s952_s24 = sadd.s32 1, %s857_s21  }
  0x15   : > { %s30_s27 = sadd.s32 1, %s853_s20  ;;  %s27_s28 = ssub.s32 %s857_s21, %s952_s24 }
  0x16   : > { %p37_p7 = scmp.ne.s32.totalorder %s853_s20, %s849_s19  ;;  %p28_p8 = scmp.eq.s32.totalorder %s27_s28, 0 }
  0x17   : > { %p38_p9 = scmp.eq.s32.totalorder %s857_s21, 0  ;;  %p43_p10 = scmp.ne.s32.totalorder %s849_s19, %s845_s18 }
  0x18   : > { %p151_p11 = scmp.eq.s32.totalorder %s920_s25, 1  ;;  %p157_p0 = scmp.eq.s32.totalorder %s563_s23, 1 }
  0x19   : > { %s964_s29 = scalar_select %p28_p8, %s853_s20, %s30_s27  }
  0x1a   : > { %p968_p12 = por %p44_p1, %p43_p10  ;;  %p972_p13 = por %p151_p11, %p37_p7 }
  0x1b   : > { %p39_p2 = por %p38_p9, %p37_p7  ;;  %s220_s7 = sand.u32 1, %s853_s20  }
  0x1c   : > { %p977_p4 = por %p157_p0, %p43_p10  ;;  %p618_p6 = scmp.lt.s32.totalorder %s857_s21, 2 }
  0x1d   : > { %s569_s9 = sshll.u32 %s220_s7, 3  ;;  %s570_s10 = sshll.u32 %s857_s21, 3 }
  0x1e   : > { %s228_s13 = scalar_lea.hbm %s1062_s0, %s570_s10  ;;  %s224_s15 = scalar_lea.vmem [#allocation2], %s569_s9 }
  0x1f   : > { %s230_s14 = sshll.u32 %s228_s13, 4  ;;  %s232_s16 = sshll.u32 %s224_s15, 4  ;;  %s231_s14 = int_to_ptr.hbm [resolvable:$true] %s230_s14  ;;  %s233_s16 = int_to_ptr.vmem [resolvable:$true] %s232_s16 }
  0x20   : > { %p986_p8 = pnand %p618_p6, %p39_p2  ;;  %s221_s22 = scalar_lea.sflag [#allocation3], %s220_s7 }
  0x21   : > { %s753_s23 = sshra.s32 %s231_s14, 4  ;;  %s760_s9 = scalar_lea.hbm %s1062_s0, 16  ;;  %s754_s23 = int_to_ptr.hbm [resolvable:$true] %s753_s23 }
  0x22   : > { %s755_s27 = scalar_lea.hbm %s754_s23, 8  ;;  %p757_p9 = pneg %p986_p8 }
  0x23   : > { %p756_p7 = scmp.ne.s32.totalorder %s754_s23, %s755_s27  ;;  %p761_p0 = scmp.lt.s32.totalorder %s754_s23, %s1062_s0 }
  0x24   : > { %p762_p2 = scmp.lt.s32.totalorder %s760_s9, %s755_s27 }
  0x25   : > { %p758_p10 = pnand %p757_p9, %p756_p7 }
  0x26   : > { %p763_p6 = por %p762_p2, %p761_p0 }
  0x27   : > { %p759_p11 = pneg %p758_p10 }
  0x29   : > { %p764_p5 = pnand %p763_p6, %p759_p11 }
  0x2b   : > { %767 = shalt.err (!%p764_p5)
}
  0x2c   : > { %610 = dma.hbm_to_vmem [thread:$0]  (!%p986_p8), %s231_s14, 128, %s233_s16, %s221_s22  }
  0x2d   : > { %241 = sbr.rel (%p925_p3) target bundleno = 356 (0x164), region = 40  ;;  %s1003_s7 = sand.u32 (!%p925_p3), 1, %s849_s19  }
  0x2e   : > { %s572_s13 = sshll.u32 (!%p925_p3), %s1003_s7, 3  ;;  %s244_s15 = scalar_lea.sflag (!%p925_p3), [#allocation3], %s1003_s7 }
  0x2f   : > { %s1009_s23 = scalar_lea.vmem (!%p925_p3), [#allocation2], %s572_s13 }
  0x32   : > { %828 = dma.done.wait (%p968_p12), %s244_s15, 128  }
  0x33   : > { %830 = vsyncadd (%p968_p12), %s244_s15, 4294967168 }
  0x34   : > { %832 = dma.done.wait (%p44_p1), [#allocation6], 4128  }
  0x35   : > { %834 = vsyncadd (%p44_p1), [#allocation6], 4294963168 }
  0x36   : > { %836 = dma.done.wait (%p44_p1), [#allocation9], 4096  }
  0x37   : > { %838 = vsyncadd (%p44_p1), [#allocation9], 4294963200  ;;  %v321_v0 = vld [vmem:[#allocation5 + $0xf0] sm:$0xff]  ;;  %v319_v1 = vld [vmem:[#allocation5 + $0xe0] sm:$0xff]  ;;  %s578_s26 = sshll.u32 %s920_s25, 3  ;;  %s289_s27 = scalar_lea.vmem [#allocation10], %s572_s13 }
  0x38   : > { %v322_v2 = vld [vmem:[#allocation5 + $0xf8] sm:$0xff]  ;;  %329 = vmatpush.msra.mxu0 %v321_v0  ;;  %v320_v3 = vld [vmem:[#allocation5 + $0xe8] sm:$0xff]  ;;  %v317_v4 = vld [vmem:[#allocation5 + $0xd0] sm:$0xff]  ;;  %s459_s22 = scalar_lea.hbm %s1067_s5, %s578_s26  ;;  %s461_s28 = sshll.u32 %s289_s27, 4  ;;  %s462_s28 = int_to_ptr.vmem [resolvable:$true] %s461_s28 }
  0x39   : > { %349 = vmatpush.msra.mxu1 %v322_v2  ;;  %v318_v5 = vld [vmem:[#allocation5 + $0xd8] sm:$0xff]  ;;  %v315_v6 = vld [vmem:[#allocation5 + $0xc0] sm:$0xff]  ;;  %v316_v7 = vld [vmem:[#allocation5 + $0xc8] sm:$0xff]  ;;  %s463_s10 = sshll.u32 %s459_s22, 4  ;;  %s449_s25 = scalar_lea.sflag [#allocation4], %s1003_s7  ;;  %s464_s10 = int_to_ptr.hbm [resolvable:$true] %s463_s10 }
  0x3a   : > { %330 = vmatpush.msra.mxu0 %v319_v1  ;;  %v313_v8 = vld [vmem:[#allocation5 + $0xb0] sm:$0xff]  ;;  %v314_v9 = vld [vmem:[#allocation5 + $0xb8] sm:$0xff]  ;;  %v311_v10 = vld [vmem:[#allocation5 + $0xa0] sm:$0xff]  ;;  %s797_s9 = sshra.s32 %s464_s10, 4  ;;  %s798_s9 = int_to_ptr.hbm [resolvable:$true] %s797_s9 }
  0x3b   : > { %350 = vmatpush.msra.mxu1 %v320_v3  ;;  %v312_v11 = vld [vmem:[#allocation5 + $0xa8] sm:$0xff]  ;;  %v309_v12 = vld [vmem:[#allocation5 + $0x90] sm:$0xff]  ;;  %v310_v13 = vld [vmem:[#allocation5 + $0x98] sm:$0xff]  ;;  %s799_s11 = scalar_lea.hbm %s798_s9, 8  ;;  %p804_p12 = scmp.lt.s32.totalorder %s798_s9, %s1067_s5 }
  0x3c   : > { %331 = vmatpush.msra.mxu0 %v317_v4  ;;  %v386_v14 = vld [vmem:[#allocation8 + $0x78] sm:$0xff]  ;;  %v385_v15 = vld [vmem:[#allocation8 + $0x70] sm:$0xff]  ;;  %v308_v18 = vld [vmem:[#allocation5 + $0x88] sm:$0xff]  ;;  %p800_p1 = scmp.ne.s32.totalorder %s798_s9, %s799_s11 }
  0x3d   : > { %351 = vmatpush.msra.mxu1 %v318_v5  ;;  %v402_v16 = vld [vmem:[#allocation8 + $0xf8] sm:$0xff]  ;;  %407 = vmatpush.msra.mxu2 %v386_v14  ;;  %v401_v19 = vld [vmem:[#allocation8 + $0xf0] sm:$0xff]  ;;  %v384_v20 = vld [vmem:[#allocation8 + $0x68] sm:$0xff] }
  0x3e   : > { %332 = vmatpush.msra.mxu0 %v315_v6  ;;  %v307_v17 = vld [vmem:[#allocation5 + $0x80] sm:$0xff]  ;;  %427 = vmatpush.msra.mxu3 %v402_v16  ;;  %v400_v21 = vld [vmem:[#allocation8 + $0xe8] sm:$0xff]  ;;  %v306_v23 = vld [vmem:[#allocation5 + $0x78] sm:$0xff]  ;;  %p801_p3 = pnand %p800_p1, %p972_p13 }
  0x3f   : > { %352 = vmatpush.msra.mxu1 %v316_v7  ;;  %v305_v22 = vld [vmem:[#allocation5 + $0x70] sm:$0xff]  ;;  %408 = vmatpush.msra.mxu2 %v385_v15  ;;  %v383_v24 = vld [vmem:[#allocation8 + $0x60] sm:$0xff]  ;;  %v382_v28 = vld [vmem:[#allocation8 + $0x58] sm:$0xff] }
  0x40   : > { %333 = vmatpush.msra.mxu0 %v313_v8  ;;  %428 = vmatpush.msra.mxu3 %v401_v19  ;;  %v399_v25 = vld [vmem:[#allocation8 + $0xe0] sm:$0xff]  ;;  %v398_v29 = vld [vmem:[#allocation8 + $0xd8] sm:$0xff]  ;;  %v301_v30 = vld [vmem:[#allocation5 + $0x50] sm:$0xff]  ;;  %p802_p5 = pneg %p801_p3 }
  0x41   : > { %353 = vmatpush.msra.mxu1 %v314_v9  ;;  %v303_v26 = vld [vmem:[#allocation5 + $0x60] sm:$0xff]  ;;  %v304_v27 = vld [vmem:[#allocation5 + $0x68] sm:$0xff]  ;;  %409 = vmatpush.msra.mxu2 %v384_v20  ;;  %v302_v31 = vld [vmem:[#allocation5 + $0x58] sm:$0xff] }
  0x42   : > { %334 = vmatpush.msra.mxu0 %v311_v10  ;;  %429 = vmatpush.msra.mxu3 %v400_v21  ;;  %v381_v32 = vld [vmem:[#allocation8 + $0x50] sm:$0xff]  ;;  %v299_v34 = vld [vmem:[#allocation5 + $0x40] sm:$0xff]  ;;  %v300_v35 = vld [vmem:[#allocation5 + $0x48] sm:$0xff] }
  0x43   : > { %354 = vmatpush.msra.mxu1 %v312_v11  ;;  %410 = vmatpush.msra.mxu2 %v383_v24  ;;  %v397_v33 = vld [vmem:[#allocation8 + $0xd0] sm:$0xff]  ;;  %v380_v36 = vld [vmem:[#allocation8 + $0x48] sm:$0xff]  ;;  %v379_v40 = vld [vmem:[#allocation8 + $0x40] sm:$0xff] }
  0x44   : > { %335 = vmatpush.msra.mxu0 %v309_v12  ;;  %430 = vmatpush.msra.mxu3 %v399_v25  ;;  %v396_v37 = vld [vmem:[#allocation8 + $0xc8] sm:$0xff]  ;;  %v298_v39 = vld [vmem:[#allocation5 + $0x38] sm:$0xff]  ;;  %v395_v41 = vld [vmem:[#allocation8 + $0xc0] sm:$0xff] }
  0x45   : > { %355 = vmatpush.msra.mxu1 %v310_v13  ;;  %411 = vmatpush.msra.mxu2 %v382_v28  ;;  %v297_v38 = vld [vmem:[#allocation5 + $0x30] sm:$0xff]  ;;  %v295_v42 = vld [vmem:[#allocation5 + $0x20] sm:$0xff]  ;;  %v296_v43 = vld [vmem:[#allocation5 + $0x28] sm:$0xff] }
  0x46   : > { %336 = vmatpush.msra.mxu0 %v307_v17  ;;  %431 = vmatpush.msra.mxu3 %v398_v29  ;;  %v378_v44 = vld [vmem:[#allocation8 + $0x38] sm:$0xff]  ;;  %v293_v46 = vld [vmem:[#allocation5 + $0x10] sm:$0xff]  ;;  %v292_v51 = vld [vmem:[#allocation5 + $0x8] sm:$0xff] }
  0x47   : > { %356 = vmatpush.msra.mxu1 %v308_v18  ;;  %412 = vmatpush.msra.mxu2 %v381_v32  ;;  %v394_v45 = vld [vmem:[#allocation8 + $0xb8] sm:$0xff]  ;;  %v377_v48 = vld [vmem:[#allocation8 + $0x30] sm:$0xff]  ;;  %v376_v53 = vld [vmem:[#allocation8 + $0x28] sm:$0xff] }
  0x48   : > { %337 = vmatpush.msra.mxu0 %v305_v22  ;;  %432 = vmatpush.msra.mxu3 %v397_v33  ;;  %v294_v47 = vld [vmem:[#allocation5 + $0x18] sm:$0xff]  ;;  %v291_v50 = vld [vmem:[#allocation5] sm:$0xff]  ;;  %v392_v54 = vld [vmem:[#allocation8 + $0xa8] sm:$0xff] }
  0x49   : > { %357 = vmatpush.msra.mxu1 %v306_v23  ;;  %413 = vmatpush.msra.mxu2 %v380_v36  ;;  %v393_v49 = vld [vmem:[#allocation8 + $0xb0] sm:$0xff]  ;;  %v375_v55 = vld [vmem:[#allocation8 + $0x20] sm:$0xff]  ;;  %v374_v57 = vld [vmem:[#allocation8 + $0x18] sm:$0xff] }
  0x4a   : > { %338 = vmatpush.msra.mxu0 %v303_v26  ;;  %433 = vmatpush.msra.mxu3 %v396_v37  ;;  %v290_v52 = vld [vmem:[%s1009_s23] sm:$0xff]  ;;  %v391_v56 = vld [vmem:[#allocation8 + $0xa0] sm:$0xff]  ;;  %v323_v1 = vld [vmem:[#allocation7] sm:$0x3]  ;;  %s803_s23 = scalar_lea.hbm %s1067_s5, 16 }
  0x4b   : > { %358 = vmatpush.msra.mxu1 %v304_v27  ;;  %414 = vmatpush.msra.mxu2 %v379_v40  ;;  %v373_v58 = vld [vmem:[#allocation8 + $0x10] sm:$0xff]  ;;  %v390_v59 = vld [vmem:[#allocation8 + $0x98] sm:$0xff]  ;;  %v372_v60 = vld [vmem:[#allocation8 + $0x8] sm:$0xff]  ;;  %v325_v2 = vperm.slane %v323_v1, 0  ;;  %v326_v3 = vperm.slane %v323_v1, 1  ;;  %p805_p8 = scmp.lt.s32.totalorder %s803_s23, %s799_s11 }
  0x4c   : > { %339 = vmatpush.msra.mxu0 %v301_v30  ;;  %434 = vmatpush.msra.mxu3 %v395_v41  ;;  %v389_v61 = vld [vmem:[#allocation8 + $0x90] sm:$0xff]  ;;  %v371_v62 = vld [vmem:[#allocation8] sm:$0xff]  ;;  %v388_v63 = vld [vmem:[#allocation8 + $0x88] sm:$0xff] }
  0x4d   : > { %359 = vmatpush.msra.mxu1 %v302_v31  ;;  %415 = vmatpush.msra.mxu2 %v378_v44  ;;  %v387_v0 = vld [vmem:[#allocation8 + $0x80] sm:$0xff]  ;;  %v662_v10 = vld [vmem:[%s1066_s4] ss:$0 sm:$0xff]  ;;  %p806_p7 = por %p805_p8, %p804_p12 }
  0x4e   : > { %340 = vmatpush.msra.mxu0 %v299_v34  ;;  %435 = vmatpush.msra.mxu3 %v394_v45 }
  0x4f   : > { %360 = vmatpush.msra.mxu1 %v300_v35  ;;  %416 = vmatpush.msra.mxu2 %v377_v48  ;;  %p807_p9 = pnand %p806_p7, %p802_p5 }
  0x50   : > { %341 = vmatpush.msra.mxu0 %v297_v38  ;;  %436 = vmatpush.msra.mxu3 %v393_v49 }
  0x51   : > { %361 = vmatpush.msra.mxu1 %v298_v39  ;;  %417 = vmatpush.msra.mxu2 %v376_v53 }
  0x52   : > { %342 = vmatpush.msra.mxu0 %v295_v42  ;;  %437 = vmatpush.msra.mxu3 %v392_v54 }
  0x53   : > { %362 = vmatpush.msra.mxu1 %v296_v43  ;;  %418 = vmatpush.msra.mxu2 %v375_v55 }
  0x54   : > { %343 = vmatpush.msra.mxu0 %v293_v46  ;;  %438 = vmatpush.msra.mxu3 %v391_v56 }
  0x55   : > { %363 = vmatpush.msra.mxu1 %v294_v47  ;;  %419 = vmatpush.msra.mxu2 %v374_v57 }
  0x56   : > { %344 = vmatpush.msra.mxu0 %v291_v50  ;;  %439 = vmatpush.msra.mxu3 %v390_v59 }
  0x57   : > { %364 = vmatpush.msra.mxu1 %v292_v51  ;;  %345 = vmatmul.f32.vlgmr.msra.gmra.mxu0 %v290_v52 }
  0x58   : > { %365 = vmatmul.f32.vlgmr.msra.gmra.mxu1 %v290_v52  ;;  %420 = vmatpush.msra.mxu2 %v373_v58 }
  0x59   : > { %440 = vmatpush.msra.mxu3 %v389_v61 }
  0x5a   : > { %421 = vmatpush.msra.mxu2 %v372_v60 }
  0x5b   : > { %441 = vmatpush.msra.mxu3 %v388_v63 }
  0x5c   : > { %422 = vmatpush.msra.mxu2 %v371_v62 }
  0x5d   : > { %442 = vmatpush.msra.mxu3 %v387_v0 }
  0xd4   : > { %v346_v4 = vpop.f32.mrf.mxu0 }
  0xd5   : > { %v366_v5 = vpop.f32.mrf.mxu1  ;;  %v347_v6 = vadd.f32 %v346_v4, %v325_v2 }
  0xd6   : > { %v367_v7 = vadd.f32 %v366_v5, %v326_v3 }
  0xd7   : > { %v369_v8 = vmax.f32 %v347_v6, 0.0 }
  0xd8   : > { %v370_v9 = vmax.f32 %v367_v7, 0.0 }
  0xd9   : > { %423 = vmatmul.f32.vlgmr.msra.gmra.mxu2 %v369_v8 }
  0xda   : > { %443 = vmatmul.f32.vlgmr.msra.gmra.mxu3 %v370_v9 }
 0x15c   : > { %v424_v11 = vpop.f32.mrf.mxu2 }
 0x15d   : > { %v444_v12 = vpop.f32.mrf.mxu3  ;;  %v425_v13 = vadd.f32 %v662_v10, %v424_v11 }
 0x15f   : > { %v445_v14 = vadd.f32 %v444_v12, %v425_v13 }
 0x161   : > { %447 = vst [vmem:[%s289_s27] sm:$0xff] %v445_v14 }
 0x162   : > { %810 = shalt.err (!%p807_p9)
}
 0x163   : > { %595 = dma.vmem_to_hbm [thread:$0]  (%p972_p13), %s462_s28, 128, %s464_s10, %s449_s25  }
 0x164 PF: > { %s475_s7 = sand.u32 1, %s845_s18   ;;  %p1074_p10 = scmp.ge.s32.totalorder %s857_s21, 2 }
 0x165   : > { %s476_s30 = scalar_lea.sflag [#allocation4], %s475_s7 }
 0x166   : > { %p612_p11 = pnand %p1074_p10, %p977_p4 }
 0x168   : > { %p613_p0 = pneg %p612_p11 }
 0x16a   : > { %840 = dma.done.wait (%p613_p0), %s476_s30, 128  }
 0x16b   : > { %842 = vsyncadd (%p613_p0), %s476_s30, 4294967168  ;;  %p20_p2 = scmp.ge.s32.totalorder %s952_s24, 4   ;;  %s1075_s18 = smov %s849_s19 }
 0x16c   : > { %s1076_s19 = smov %s853_s20  ;;  %s1077_s20 = smov %s964_s29 }
 0x16d   : > { %s1078_s21 = smov %s952_s24  ;;  %22 = sbr.rel (!%p20_p2) target bundleno = 7 (0x7), region = 97 }
 0x172   :  { %482 = vsyncpa [#allocation3], 1 }
 0x173   :  { %484 = vsyncpa [#allocation3 + $0x1], 1 }
 0x174   :  { %485 = vsyncpa [#allocation6], 1 }
 0x175   :  { %486 = vsyncpa [#allocation9], 1 }
 0x176   :  { %487 = vsyncpa [#allocation4], 1 }
 0x177   :  { %489 = vsyncpa [#allocation4 + $0x1], 1 }

</bundles_post_ra>
